<compile_context>
chip_gen: v5e
topology: v5e:2x2
jax: 0.10.0
libtpu: 0.0.40
codegen_flags: <defaults>
</compile_context>

<pallas_src>
import math

import jax
import jax.numpy as jnp
from jax.experimental import pallas as pl
from jax.experimental.pallas import tpu as pltpu


def _round_up(x, m):
    return ((x + m - 1) // m) * m


def _pick_tile(dim, candidates):
    for c in candidates:
        if dim % c == 0:
            return c
    return dim


def _mm_kernel(a_ref, b_ref, o_ref, acc_ref):
    @pl.when(pl.program_id(2) == 0)
    def _():
        acc_ref[...] = jnp.zeros_like(acc_ref)

    acc_ref[...] += jnp.dot(
        a_ref[...], b_ref[...], preferred_element_type=jnp.float32
    )

    @pl.when(pl.program_id(2) == pl.num_programs(2) - 1)
    def _():
        o_ref[...] = acc_ref[...].astype(o_ref.dtype)


def _mm_bias_kernel(a_ref, b_ref, bias_ref, o_ref, acc_ref):
    @pl.when(pl.program_id(2) == 0)
    def _():
        acc_ref[...] = jnp.zeros_like(acc_ref)

    acc_ref[...] += jnp.dot(
        a_ref[...], b_ref[...], preferred_element_type=jnp.float32
    )

    @pl.when(pl.program_id(2) == pl.num_programs(2) - 1)
    def _():
        # Bias added exactly once per output tile, in the finalize branch.
        o_ref[...] = (acc_ref[...] + bias_ref[...]).astype(o_ref.dtype)


def _tiled_matmul(a, b, bias=None, out_dtype=jnp.float32):
    """Tiled C = A @ B (+ bias). A:[M,K], B:[K,N], bias:[1,N] f32 or None.

    All dims must already be multiples of 128 (caller pads).
    """
    m, k = a.shape
    k2, n = b.shape
    assert k == k2

    tm = _pick_tile(m, (256, 128))
    tn = _pick_tile(n, (256, 128))
    tk = _pick_tile(k, (512, 256, 128))
    grid = (m // tm, n // tn, k // tk)

    a_spec = pl.BlockSpec((tm, tk), lambda i, j, l: (i, l))
    b_spec = pl.BlockSpec((tk, tn), lambda i, j, l: (l, j))
    out_spec = pl.BlockSpec((tm, tn), lambda i, j, l: (i, j))

    flops = 2 * m * n * k
    bytes_accessed = (
        a.size * a.dtype.itemsize
        + b.size * b.dtype.itemsize
        + m * n * jnp.dtype(out_dtype).itemsize
    )

    if bias is None:
        kernel = _mm_kernel
        in_specs = [a_spec, b_spec]
        operands = (a, b)
    else:
        kernel = _mm_bias_kernel
        bias_spec = pl.BlockSpec((1, tn), lambda i, j, l: (0, j))
        in_specs = [a_spec, b_spec, bias_spec]
        operands = (a, b, bias)
        bytes_accessed += bias.size * bias.dtype.itemsize

    return pl.pallas_call(
        kernel,
        out_shape=jax.ShapeDtypeStruct((m, n), out_dtype),
        grid_spec=pltpu.PrefetchScalarGridSpec(
            num_scalar_prefetch=0,
            grid=grid,
            in_specs=in_specs,
            out_specs=out_spec,
            scratch_shapes=[pltpu.VMEM((tm, tn), jnp.float32)],
        ),
        compiler_params=pltpu.CompilerParams(
            dimension_semantics=("parallel", "parallel", "arbitrary"),
        ),
        cost_estimate=pl.CostEstimate(
            flops=flops, transcendentals=0, bytes_accessed=bytes_accessed
        ),
    )(*operands)


def graph_convolution(x, adj, weight, bias=None):
    """Pallas GCN forward: adj @ (x @ weight) (+ bias). Returns f32 [N, F_out]."""
    n, f_in = x.shape
    f_out = weight.shape[1]
    assert adj.shape == (n, n)
    assert weight.shape[0] == f_in

    # Pad every dim to a multiple of 128: lane-dense output tiles, (8,128)
    # block constraint always satisfied. Zero padding keeps results exact.
    n_pad = _round_up(n, 128)
    f_in_pad = _round_up(f_in, 128)
    f_out_pad = _round_up(f_out, 128)

    # bf16 operands; in-kernel accumulation stays f32.
    x_p = (
        jnp.zeros((n_pad, f_in_pad), jnp.bfloat16)
        .at[:n, :f_in]
        .set(x.astype(jnp.bfloat16))
    )
    w_p = (
        jnp.zeros((f_in_pad, f_out_pad), jnp.bfloat16)
        .at[:f_in, :f_out]
        .set(weight.astype(jnp.bfloat16))
    )
    adj_p = (
        jnp.zeros((n_pad, n_pad), jnp.bfloat16)
        .at[:n, :n]
        .set(adj.astype(jnp.bfloat16))
    )

    # support = X @ W  (kept bf16: it is streamed again as the B operand below)
    support = _tiled_matmul(x_p, w_p, bias=None, out_dtype=jnp.bfloat16)

    if bias is not None:
        bias_p = (
            jnp.zeros((1, f_out_pad), jnp.float32)
            .at[0, :f_out]
            .set(bias.reshape(-1).astype(jnp.float32))
        )
        out_p = _tiled_matmul(adj_p, support, bias=bias_p, out_dtype=jnp.float32)
    else:
        out_p = _tiled_matmul(adj_p, support, bias=None, out_dtype=jnp.float32)

    return out_p[:n, :f_out]


def kaiming_uniform(key, shape):
    """Matches torch.nn.init.kaiming_uniform_ defaults (a=0, fan_in, leaky_relu)."""
    fan_in = shape[0]
    gain = math.sqrt(2.0)
    bound = gain * math.sqrt(3.0 / fan_in)
    return jax.random.uniform(
        key, shape, dtype=jnp.float32, minval=-bound, maxval=bound
    )


if __name__ == "__main__":
    key = jax.random.PRNGKey(0)
    k_x, k_adj, k_w = jax.random.split(key, 3)

    num_nodes = 16
    in_features = 32
    out_features = 32

    # Deterministic parameter init (mirrors reset_parameters()).
    weight = kaiming_uniform(k_w, (in_features, out_features))
    bias = jnp.zeros((out_features,), dtype=jnp.float32)

    # Example inputs: node features + a symmetric row-normalized adjacency.
    x = jax.random.normal(k_x, (num_nodes, in_features), dtype=jnp.float32)
    a = jax.random.uniform(k_adj, (num_nodes, num_nodes), dtype=jnp.float32)
    a = (a + a.T) * 0.5 + jnp.eye(num_nodes, dtype=jnp.float32)
    adj = a / jnp.sum(a, axis=1, keepdims=True)

    out = graph_convolution(x, adj, weight, bias)
    out = jax.block_until_ready(out)

    # Reference check in plain JAX (f32). bf16 operands -> loose tolerance.
    ref = adj @ (x @ weight) + bias
    assert out.shape == (num_nodes, out_features)
    assert jnp.allclose(out, ref, atol=5e-2, rtol=5e-2), (
        float(jnp.max(jnp.abs(out - ref)))
    )

    # Also exercise the bias=None path (no bias DMA / add emitted).
    out_nb = jax.block_until_ready(graph_convolution(x, adj, weight, None))
    ref_nb = adj @ (x @ weight)
    assert jnp.allclose(out_nb, ref_nb, atol=5e-2, rtol=5e-2)

    print("KERNEL_OK")
</pallas_src>

<mosaic_0001>
module attributes {stable_mosaic.version = 11 : i64} {
  func.func @_mm_kernel(%arg0: i32, %arg1: i32, %arg2: i32, %arg3: memref<128x128xbf16, #tpu.memory_space<vmem>>, %arg4: memref<128x128xbf16, #tpu.memory_space<vmem>>, %arg5: memref<128x128xbf16, #tpu.memory_space<vmem>>, %arg6: memref<128x128xf32, #tpu.memory_space<vmem>>) attributes {dimension_semantics = [#tpu.dimension_semantics<parallel>, #tpu.dimension_semantics<parallel>, #tpu.dimension_semantics<arbitrary>], iteration_bounds = array<i64: 1, 1, 1>, scalar_prefetch = 0 : i64, scratch_operands = 1 : i64, tpu.core_type = #tpu.core_type<tc>, window_params = [{transform_indices = @transform_0, window_bounds = array<i64: 128, 128>}, {transform_indices = @transform_1, window_bounds = array<i64: 128, 128>}, {transform_indices = @transform_2, window_bounds = array<i64: 128, 128>}]} {
    %c0_i32 = arith.constant 0 : i32
    %0 = arith.cmpi eq, %arg2, %c0_i32 : i32
    %1 = arith.extui %0 : i1 to i32
    %c0_i32_0 = arith.constant 0 : i32
    %2 = arith.cmpi ne, %1, %c0_i32_0 : i32
    scf.if %2 {
      %cst_10 = arith.constant 0.000000e+00 : f32
      %12 = vector.broadcast %cst_10 : f32 to vector<128x128xf32>
      %c0_11 = arith.constant 0 : index
      %c0_12 = arith.constant 0 : index
      %13 = vector.load %arg6[%c0_11, %c0_12] : memref<128x128xf32, #tpu.memory_space<vmem>>, vector<128x128xf32>
      tpu.vector_store %arg6[%c0_11, %c0_12], %12 {strides = array<i32>} : memref<128x128xf32, #tpu.memory_space<vmem>>, vector<128x128xf32>,
    } else {
    }
    %c0 = arith.constant 0 : index
    %c0_1 = arith.constant 0 : index
    %3 = vector.load %arg6[%c0, %c0_1] : memref<128x128xf32, #tpu.memory_space<vmem>>, vector<128x128xf32>
    %c0_2 = arith.constant 0 : index
    %c0_3 = arith.constant 0 : index
    %4 = vector.load %arg3[%c0_2, %c0_3] : memref<128x128xbf16, #tpu.memory_space<vmem>>, vector<128x128xbf16>
    %c0_4 = arith.constant 0 : index
    %c0_5 = arith.constant 0 : index
    %5 = vector.load %arg4[%c0_4, %c0_5] : memref<128x128xbf16, #tpu.memory_space<vmem>>, vector<128x128xbf16>
    %cst = arith.constant dense<0.000000e+00> : vector<128x128xf32>
    %6 = tpu.matmul %4, %5, %cst {dimension_numbers = #tpu.dot_dimension_numbers<[1], [0], [0], [1], [0, 0, 1, 1], [], []>} : vector<128x128xbf16>, vector<128x128xbf16>, vector<128x128xf32> -> vector<128x128xf32>
    %7 = arith.addf %3, %6 : vector<128x128xf32>
    %c0_6 = arith.constant 0 : index
    %c0_7 = arith.constant 0 : index
    %8 = vector.load %arg6[%c0_6, %c0_7] : memref<128x128xf32, #tpu.memory_space<vmem>>, vector<128x128xf32>
    tpu.vector_store %arg6[%c0_6, %c0_7], %7 {strides = array<i32>} : memref<128x128xf32, #tpu.memory_space<vmem>>, vector<128x128xf32>,
    %c0_i32_8 = arith.constant 0 : i32
    %9 = arith.cmpi eq, %arg2, %c0_i32_8 : i32
    %10 = arith.extui %9 : i1 to i32
    %c0_i32_9 = arith.constant 0 : i32
    %11 = arith.cmpi ne, %10, %c0_i32_9 : i32
    scf.if %11 {
      %c0_10 = arith.constant 0 : index
      %c0_11 = arith.constant 0 : index
      %12 = vector.load %arg6[%c0_10, %c0_11] : memref<128x128xf32, #tpu.memory_space<vmem>>, vector<128x128xf32>
      %13 = arith.truncf %12 : vector<128x128xf32> to vector<128x128xbf16>
      %c0_12 = arith.constant 0 : index
      %c0_13 = arith.constant 0 : index
      %14 = vector.load %arg5[%c0_12, %c0_13] : memref<128x128xbf16, #tpu.memory_space<vmem>>, vector<128x128xbf16>
      tpu.vector_store %arg5[%c0_12, %c0_13], %13 {strides = array<i32>} : memref<128x128xbf16, #tpu.memory_space<vmem>>, vector<128x128xbf16>,
    } else {
    }
    return
  }
  func.func @transform_0(%arg0: i32, %arg1: i32, %arg2: i32) -> (i32, i32) {
    %c0_i32 = arith.constant 0 : i32
    return %arg0, %arg2 : i32, i32
  }
  func.func @transform_1(%arg0: i32, %arg1: i32, %arg2: i32) -> (i32, i32) {
    %c0_i32 = arith.constant 0 : i32
    return %arg2, %arg1 : i32, i32
  }
  func.func @transform_2(%arg0: i32, %arg1: i32, %arg2: i32) -> (i32, i32) {
    %c0_i32 = arith.constant 0 : i32
    return %arg0, %arg1 : i32, i32
  }
}

</mosaic_0001>

<bundles_post_ra>
// kernel: tpu_custom_call.1
= control target key start
LH: loop header
LB: loop body
LE: loop exit
PB: predicated region body
PF: predicated region fallthrough
CT: control target
= control target key end

     0   :  { %7 = vsyncpa [#allocation4], 0  ;;  %s632_s0 = inlined_call_operand.hbm [shape: bf16[128,128], index: 0, kind: input, shape index: {}]   ;;  %s633_s1 = inlined_call_operand.hbm [shape: bf16[128,128], index: 1, kind: input, shape index: {}]   ;;  %s634_s2 = inlined_call_operand.hbm [shape: bf16[128,128], index: 2, kind: output, shape index: {}]  }
   0x1   :  { %8 = vsyncpa [#allocation7], 0 }
   0x2   :  { %9 = vsyncpa [#allocation5], 0  ;;  %s14_s11 = sshll.u32 %s632_s0, 4  ;;  %s594_s12 = smov [#allocation3]   ;;  %s15_s11 = int_to_ptr.hbm [resolvable:$true] %s14_s11 }
   0x3   :  { %s16_s13 = sshll.u32 %s594_s12, 4  ;;  %s27_s16 = sshll.u32 %s633_s1, 4  ;;  %s17_s13 = int_to_ptr.vmem [resolvable:$true] %s16_s13  ;;  %s28_s16 = int_to_ptr.hbm [resolvable:$true] %s27_s16 }
   0x4   :  { %s595_s17 = smov 64   ;;  %s596_s18 = smov 4  }
   0x5   :  { %22 = dma.hbm_to_vmem [thread:$0]  %s15_s11, 1024, %s17_s13, [#allocation4], %s595_s17, %s595_s17, %s596_s18  }
   0x6   :  { %s597_s19 = smov [#allocation6]  }
   0x7   :  { %s29_s20 = sshll.u32 %s597_s19, 4  ;;  %s30_s20 = int_to_ptr.vmem [resolvable:$true] %s29_s20 }
   0x8   :  { %35 = dma.hbm_to_vmem [thread:$0]  %s28_s16, 1024, %s30_s20, [#allocation7], %s595_s17, %s595_s17, %s596_s18  }
   0x9   :  { %588 = dma.done.wait [#allocation4], 1024  }
   0xa   :  { %589 = vsyncadd [#allocation4], 4294966272 }
   0xb   :  { %590 = dma.done.wait [#allocation7], 1024  }
   0xc   :  { %591 = vsyncadd [#allocation7], 4294966272  ;;  %v439_v0 = vld [vmem:[#allocation6 + $0x38] sm:$0xff]  ;;  %v438_v1 = vld [vmem:[#allocation6 + $0x30] sm:$0xff]  ;;  %s598_s0 = smov [#allocation8]   ;;  %s346_s23 = sshll.u32 %s634_s2, 4  ;;  %s347_s23 = int_to_ptr.hbm [resolvable:$true] %s346_s23 }
   0xd   :  { %208 = vmatpush.bf16.msra.mxu0 %v439_v0  ;;  %487 = vmatpush.bf16.msra.mxu1 %v439_v0  ;;  %v437_v2 = vld [vmem:[#allocation6 + $0x28] sm:$0xff]  ;;  %v436_v3 = vld [vmem:[#allocation6 + $0x20] sm:$0xff]  ;;  %v435_v4 = vld [vmem:[#allocation6 + $0x18] sm:$0xff]  ;;  %s344_s1 = sshll.u32 %s598_s0, 4  ;;  %s345_s1 = int_to_ptr.vmem [resolvable:$true] %s344_s1 }
   0xe   :  { %488 = vmatpush.bf16.msra.mxu2 %v439_v0  ;;  %489 = vmatpush.bf16.msra.mxu3 %v439_v0  ;;  %v434_v5 = vld [vmem:[#allocation6 + $0x10] sm:$0xff]  ;;  %v433_v6 = vld [vmem:[#allocation6 + $0x8] sm:$0xff]  ;;  %v432_v7 = vld [vmem:[#allocation6] sm:$0xff] }
   0xf   :  { %v424_v8 = vld [vmem:[#allocation3] sm:$0xff]  ;;  %v426_v9 = vld [vmem:[#allocation3 + $0x10] sm:$0xff]  ;;  %v425_v12 = vld [vmem:[#allocation3 + $0x8] sm:$0xff] }
  0x10   :  { %v428_v10 = vld [vmem:[#allocation3 + $0x20] sm:$0xff]  ;;  %v430_v11 = vld [vmem:[#allocation3 + $0x30] sm:$0xff]  ;;  %v427_v13 = vld [vmem:[#allocation3 + $0x18] sm:$0xff] }
  0x11   :  { %209 = vmatpush.bf16.msra.mxu0 %v438_v1  ;;  %490 = vmatpush.bf16.msra.mxu1 %v438_v1  ;;  %v429_v14 = vld [vmem:[#allocation3 + $0x28] sm:$0xff]  ;;  %v431_v15 = vld [vmem:[#allocation3 + $0x38] sm:$0xff] }
  0x12   :  { %491 = vmatpush.bf16.msra.mxu2 %v438_v1  ;;  %492 = vmatpush.bf16.msra.mxu3 %v438_v1 }
  0x15   :  { %210 = vmatpush.bf16.msra.mxu0 %v437_v2  ;;  %493 = vmatpush.bf16.msra.mxu1 %v437_v2 }
  0x16   :  { %494 = vmatpush.bf16.msra.mxu2 %v437_v2  ;;  %495 = vmatpush.bf16.msra.mxu3 %v437_v2 }
  0x19   :  { %211 = vmatpush.bf16.msra.mxu0 %v436_v3  ;;  %496 = vmatpush.bf16.msra.mxu1 %v436_v3 }
  0x1a   :  { %497 = vmatpush.bf16.msra.mxu2 %v436_v3  ;;  %498 = vmatpush.bf16.msra.mxu3 %v436_v3 }
  0x1d   :  { %212 = vmatpush.bf16.msra.mxu0 %v435_v4  ;;  %499 = vmatpush.bf16.msra.mxu1 %v435_v4 }
  0x1e   :  { %500 = vmatpush.bf16.msra.mxu2 %v435_v4  ;;  %501 = vmatpush.bf16.msra.mxu3 %v435_v4 }
  0x21   :  { %213 = vmatpush.bf16.msra.mxu0 %v434_v5  ;;  %502 = vmatpush.bf16.msra.mxu1 %v434_v5 }
  0x22   :  { %503 = vmatpush.bf16.msra.mxu2 %v434_v5  ;;  %504 = vmatpush.bf16.msra.mxu3 %v434_v5 }
  0x25   :  { %214 = vmatpush.bf16.msra.mxu0 %v433_v6  ;;  %505 = vmatpush.bf16.msra.mxu1 %v433_v6 }
  0x26   :  { %506 = vmatpush.bf16.msra.mxu2 %v433_v6  ;;  %507 = vmatpush.bf16.msra.mxu3 %v433_v6 }
  0x29   :  { %215 = vmatpush.bf16.msra.mxu0 %v432_v7  ;;  %508 = vmatpush.bf16.msra.mxu1 %v432_v7 }
  0x2a   :  { %509 = vmatpush.bf16.msra.mxu2 %v432_v7  ;;  %510 = vmatpush.bf16.msra.mxu3 %v432_v7 }
  0x2c   :  { %216 = vmatmul.bf16.vlgmr.msra.gmra.mxu0 %v424_v8  ;;  %226 = vmatmul.bf16.vlgmr.msra.gmra.mxu1 %v426_v9 }
  0x2d   :  { %236 = vmatmul.bf16.vlgmr.msra.gmra.mxu2 %v428_v10  ;;  %246 = vmatmul.bf16.vlgmr.msra.gmra.mxu3 %v430_v11 }
  0x3c   :  { %221 = vmatmul.bf16.gmra.mxu0 %v425_v12  ;;  %231 = vmatmul.bf16.gmra.mxu1 %v427_v13 }
  0x3d   :  { %241 = vmatmul.bf16.gmra.mxu2 %v429_v14  ;;  %251 = vmatmul.bf16.gmra.mxu3 %v431_v15 }
  0xa9   :  { %v217_v16 = vpop.f32.mrf.mxu0  ;;  %v227_v17 = vpop.f32.mrf.mxu1 }
  0xb0   :  { %v237_v18 = vpop.f32.mrf.mxu2  ;;  %v247_v19 = vpop.f32.mrf.mxu3 }
  0xb1   :  { %v219_v20 = vpop.f32.mrf.mxu0  ;;  %v229_v21 = vpop.f32.mrf.mxu1 }
  0xb2   :  { %v443_v22 = vpack.c.bf16 %v219_v20, %v217_v16  ;;  %v453_v23 = vpack.c.bf16 %v229_v21, %v227_v17 }
  0xb4   :  { %444 = vst [vmem:[#allocation8] sm:$0xff] %v443_v22  }
  0xb5   :  { %481 = vst [vmem:[#allocation8 + $0x10] sm:$0xff] %v453_v23  }
  0xb8   :  { %v239_v24 = vpop.f32.mrf.mxu2  ;;  %v249_v25 = vpop.f32.mrf.mxu3 }
  0xb9   :  { %v463_v26 = vpack.c.bf16 %v239_v24, %v237_v18  ;;  %v473_v27 = vpack.c.bf16 %v249_v25, %v247_v19  ;;  %v222_v28 = vpop.f32.mrf.mxu0  ;;  %v232_v29 = vpop.f32.mrf.mxu1 }
  0xbb   :  { %483 = vst [vmem:[#allocation8 + $0x20] sm:$0xff] %v463_v26  }
  0xbc   :  { %485 = vst [vmem:[#allocation8 + $0x30] sm:$0xff] %v473_v27  }
  0xc0   :  { %v242_v30 = vpop.f32.mrf.mxu2  ;;  %v252_v31 = vpop.f32.mrf.mxu3 }
  0xc1   :  { %v224_v32 = vpop.f32.mrf.mxu0  ;;  %v234_v33 = vpop.f32.mrf.mxu1 }
  0xc2   :  { %v448_v34 = vpack.c.bf16 %v224_v32, %v222_v28  ;;  %v458_v35 = vpack.c.bf16 %v234_v33, %v232_v29 }
  0xc4   :  { %480 = vst [vmem:[#allocation8 + $0x8] sm:$0xff] %v448_v34  }
  0xc5   :  { %482 = vst [vmem:[#allocation8 + $0x18] sm:$0xff] %v458_v35  }
  0xc8   :  { %v244_v36 = vpop.f32.mrf.mxu2  ;;  %v254_v37 = vpop.f32.mrf.mxu3 }
  0xc9   :  { %v468_v38 = vpack.c.bf16 %v244_v36, %v242_v30  ;;  %v478_v39 = vpack.c.bf16 %v254_v37, %v252_v31 }
  0xcb   :  { %484 = vst [vmem:[#allocation8 + $0x28] sm:$0xff] %v468_v38  }
  0xcc   :  { %486 = vst [vmem:[#allocation8 + $0x38] sm:$0xff] %v478_v39  }
  0xcd   :  { %352 = dma.vmem_to_hbm [thread:$0]  %s345_s1, 1024, %s347_s23, [#allocation5], %s595_s17, %s595_s17, %s596_s18  }
  0xce   :  { %592 = dma.done.wait [#allocation5], 1024  }
  0xcf   :  { %593 = vsyncadd [#allocation5], 4294966272 }
  0xd0   :  { %357 = vsyncpa [#allocation4], 1 }
  0xd1   :  { %358 = vsyncpa [#allocation7], 1 }
  0xd2   :  { %359 = vsyncpa [#allocation5], 1 }

</bundles_post_ra>
